<compile_context>
chip_gen: v7x
topology: tpu7x:2x2x1
jax: 0.10.0
libtpu: 0.0.40
codegen_flags: <defaults>
</compile_context>

<pallas_src>
import functools

import jax
import jax.numpy as jnp
import numpy as np
from jax.experimental import pallas as pl
from jax.experimental.pallas import tpu as pltpu

BN_EPS = 1e-5


# ---------------------------------------------------------------------------
# Trace-time (numpy) helpers
# ---------------------------------------------------------------------------
def _build_masks_np(H, W, B_blk):
  """(8, B_blk*H*W) f32 validity masks for the 8 non-center 3x3 taps.

  Order matches the kernel's (kh, kw) iteration with the center tap skipped.
  The masks implement zero padding AND zero the lanes where an in-slab roll
  would read across an image boundary.
  """
  HW = H * W
  pos = np.arange(HW)
  row, col = pos // W, pos % W
  masks = []
  for kh in range(3):
    for kw in range(3):
      dh, dw = kh - 1, kw - 1
      if dh == 0 and dw == 0:
        continue
      m = np.ones(HW, dtype=bool)
      if dh == 1:
        m &= row < H - 1
      elif dh == -1:
        m &= row >= 1
      if dw == 1:
        m &= col < W - 1
      elif dw == -1:
        m &= col >= 1
      masks.append(m)
  m8 = np.stack(masks, axis=0).astype(np.float32)        # (8, HW)
  return np.tile(m8, (1, B_blk))                          # (8, B_blk*HW)


def _pick_batch_block(N, HW, C, itemsize=4):
  """Largest divisor of N whose working set stays well inside VMEM while
  keeping the grid >= 2 steps when N >= 2 (v7x has 2 TensorCores)."""
  budget = 8 << 20                                        # bytes / grid step
  # in + out blocks (x2 double-buffered) + stacked taps + intermediates.
  per_img = (4 * C + (9 * C + 1) + 3 * C) * HW * itemsize
  max_b = max(1, budget // max(per_img, 1))
  best = 1
  for b in range(1, N + 1):
    if N % b != 0 or b > max_b:
      continue
    if N >= 2 and N // b < 2:
      continue
    best = max(best, b)
  return best


# ---------------------------------------------------------------------------
# Pallas kernel
# ---------------------------------------------------------------------------
def _conv3x3_bn(x2d, w_flat, masks, stack_ref, *, W, L, C):
  """3x3 same-padding conv + folded BN on a (Cin, L) lane-dense slab.

  w_flat is (Cout, 9*Cin + 1): column (kh*3+kw)*Cin + ci holds
  weight[co, ci, kh, kw] * bn_scale[co]; the last column is the BN bias
  (contracted against the constant-1 row already sitting in stack_ref).
  All 9 taps are stacked on sublanes and contracted in a single MXU matmul.
  """
  mi = 0
  for kh in range(3):
    for kw in range(3):
      dh, dw = kh - 1, kw - 1
      s = dh * W + dw
      if s == 0:
        tap = x2d
      else:
        tap = pltpu.roll(x2d, shift=(-s) % L, axis=1) * masks[mi:mi + 1, :]
        mi += 1
      stack_ref[pl.ds((kh * 3 + kw) * C, C), :] = tap
  return jnp.dot(w_flat, stack_ref[...], preferred_element_type=jnp.float32)


def _basic_block_kernel(mask_ref, x_ref, w1_ref, w2_ref, o_ref, stack_ref,
                        *, W, L, C):
  """Fused conv1+bn1+relu -> conv2+bn2 -> +identity -> relu (all in VMEM)."""
  x2d = x_ref[...].astype(jnp.float32)                    # (C, L), lanes = B*HW
  masks = mask_ref[...]                                   # (8, L) f32 {0,1}

  # Constant-1 "bias tap" (last row of the stacked operand, both convs).
  stack_ref[pl.ds(9 * C, 1), :] = jnp.ones((1, L), jnp.float32)

  y1 = _conv3x3_bn(x2d, w1_ref[...], masks, stack_ref, W=W, L=L, C=C)
  y1 = jnp.maximum(y1, 0.0)                               # relu
  y2 = _conv3x3_bn(y1, w2_ref[...], masks, stack_ref, W=W, L=L, C=C)
  o_ref[...] = jnp.maximum(y2 + x2d, 0.0).astype(o_ref.dtype)


# ---------------------------------------------------------------------------
# Wrapper (BN folding, weight re-layout, lane-dense layout plumbing)
# ---------------------------------------------------------------------------
def _fold_conv_bn(w_oihw, gamma, beta, mean, var):
  """OIHW conv weight + eval-mode BN -> (Cout, 9*Cin + 1) fused weight."""
  scale = gamma / jnp.sqrt(var + BN_EPS)                  # (Cout,)
  bias = beta - mean * scale                              # (Cout,)
  cout = w_oihw.shape[0]
  # (Cout, Cin, kh, kw) -> (Cout, kh, kw, Cin) -> (Cout, 9*Cin), scale folded.
  w = jnp.transpose(w_oihw, (0, 2, 3, 1)).reshape(cout, -1) * scale[:, None]
  return jnp.concatenate([w, bias[:, None]], axis=1).astype(jnp.float32)


def basic_block_forward(x_nchw, params):
  """BasicBlock forward (stride=1, downsample=None). Input/output are NCHW."""
  N, C, H, W = x_nchw.shape
  HW = H * W

  B_blk = _pick_batch_block(N, HW, C)
  if (B_blk * HW) % 128 != 0:
    B_blk = N                     # whole-array block is always a legal spec
  L = B_blk * HW
  G = N // B_blk
  K = 9 * C + 1

  # NCHW -> (C, N*HW): lane-dense layout (wrapper transpose = layout plumbing).
  x_cl = jnp.transpose(x_nchw.reshape(N, C, HW), (1, 0, 2)).reshape(C, N * HW)

  w1 = _fold_conv_bn(params["w1"], params["gamma1"], params["beta1"],
                     params["mean1"], params["var1"])
  w2 = _fold_conv_bn(params["w2"], params["gamma2"], params["beta2"],
                     params["mean2"], params["var2"])
  masks = jnp.asarray(_build_masks_np(H, W, B_blk))       # (8, L) f32

  kernel = functools.partial(_basic_block_kernel, W=W, L=L, C=C)
  out_cl = pl.pallas_call(
      kernel,
      out_shape=jax.ShapeDtypeStruct((C, N * HW), x_nchw.dtype),
      grid=(G,),
      in_specs=[
          pl.BlockSpec((8, L), lambda i: (0, 0)),         # masks (resident)
          pl.BlockSpec((C, L), lambda i: (0, i)),         # activations
          pl.BlockSpec((C, K), lambda i: (0, 0)),         # conv1+bn1 weights
          pl.BlockSpec((C, K), lambda i: (0, 0)),         # conv2+bn2 weights
      ],
      out_specs=pl.BlockSpec((C, L), lambda i: (0, i)),
      scratch_shapes=[pltpu.VMEM((K, L), jnp.float32)],   # stacked taps
      compiler_params=pltpu.CompilerParams(
          dimension_semantics=("parallel",)),
  )(masks, x_cl, w1, w2)

  return jnp.transpose(out_cl.reshape(C, N, HW), (1, 0, 2)).reshape(N, C, H, W)


# ---------------------------------------------------------------------------
# Pure-JAX reference (correctness sanity check)
# ---------------------------------------------------------------------------
def _ref_forward(x_nchw, params):
  def conv(x, w_oihw):
    return jax.lax.conv_general_dilated(
        x, w_oihw, window_strides=(1, 1), padding=((1, 1), (1, 1)),
        dimension_numbers=("NCHW", "OIHW", "NCHW"))

  def bn(x, g, b, m, v):
    g = g[None, :, None, None]
    b = b[None, :, None, None]
    m = m[None, :, None, None]
    v = v[None, :, None, None]
    return (x - m) / jnp.sqrt(v + BN_EPS) * g + b

  out = jax.nn.relu(bn(conv(x_nchw, params["w1"]), params["gamma1"],
                       params["beta1"], params["mean1"], params["var1"]))
  out = bn(conv(out, params["w2"]), params["gamma2"],
           params["beta2"], params["mean2"], params["var2"])
  out = out + x_nchw
  return jax.nn.relu(out)


# ---------------------------------------------------------------------------
if __name__ == "__main__":
  # Small shapes consistent with BasicBlock(inplanes=4, planes=4, stride=1).
  N, C, H, W = 2, 4, 16, 16

  key = jax.random.PRNGKey(0)
  k_x, k_w1, k_w2, k_g1, k_g2, k_b1, k_b2, k_m1, k_m2, k_v1, k_v2 = (
      jax.random.split(key, 11))

  x = jax.random.normal(k_x, (N, C, H, W), jnp.float32)

  params = {
      "w1": jax.random.normal(k_w1, (C, C, 3, 3), jnp.float32) * 0.1,
      "w2": jax.random.normal(k_w2, (C, C, 3, 3), jnp.float32) * 0.1,
      "gamma1": 1.0 + 0.1 * jax.random.normal(k_g1, (C,), jnp.float32),
      "beta1": 0.1 * jax.random.normal(k_b1, (C,), jnp.float32),
      "mean1": 0.1 * jax.random.normal(k_m1, (C,), jnp.float32),
      "var1": jnp.abs(jax.random.normal(k_v1, (C,), jnp.float32)) + 0.5,
      "gamma2": 1.0 + 0.1 * jax.random.normal(k_g2, (C,), jnp.float32),
      "beta2": 0.1 * jax.random.normal(k_b2, (C,), jnp.float32),
      "mean2": 0.1 * jax.random.normal(k_m2, (C,), jnp.float32),
      "var2": jnp.abs(jax.random.normal(k_v2, (C,), jnp.float32)) + 0.5,
  }

  out = jax.block_until_ready(basic_block_forward(x, params))
  ref = jax.block_until_ready(_ref_forward(x, params))

  assert out.shape == (N, C, H, W), out.shape
  np.testing.assert_allclose(np.asarray(out), np.asarray(ref),
                             rtol=1e-4, atol=1e-4)
  print("KERNEL_OK")
</pallas_src>

<mosaic_0001>
module attributes {stable_mosaic.version = 11 : i64} {
  func.func @_basic_block_kernel(%arg0: i32, %arg1: memref<8x256xf32, #tpu.memory_space<vmem>>, %arg2: memref<4x256xf32, #tpu.memory_space<vmem>>, %arg3: memref<4x37xf32, #tpu.memory_space<vmem>>, %arg4: memref<4x37xf32, #tpu.memory_space<vmem>>, %arg5: memref<4x256xf32, #tpu.memory_space<vmem>>, %arg6: memref<37x256xf32, #tpu.memory_space<vmem>>) attributes {dimension_semantics = [#tpu.dimension_semantics<parallel>], iteration_bounds = array<i64: 2>, scalar_prefetch = 0 : i64, scratch_operands = 1 : i64, tpu.core_type = #tpu.core_type<tc>, window_params = [{pipeline_mode = #tpu.pipeline_mode<synchronous>, transform_indices = @transform_0, window_bounds = array<i64: 8, 256>}, {transform_indices = @transform_1, window_bounds = array<i64: 4, 256>}, {pipeline_mode = #tpu.pipeline_mode<synchronous>, transform_indices = @transform_2, window_bounds = array<i64: 4, 37>}, {pipeline_mode = #tpu.pipeline_mode<synchronous>, transform_indices = @transform_3, window_bounds = array<i64: 4, 37>}, {transform_indices = @transform_4, window_bounds = array<i64: 4, 256>}]} {
    %c0 = arith.constant 0 : index
    %c0_0 = arith.constant 0 : index
    %0 = vector.load %arg2[%c0, %c0_0] : memref<4x256xf32, #tpu.memory_space<vmem>>, vector<4x256xf32>
    %c0_1 = arith.constant 0 : index
    %c0_2 = arith.constant 0 : index
    %1 = vector.load %arg1[%c0_1, %c0_2] : memref<8x256xf32, #tpu.memory_space<vmem>>, vector<8x256xf32>
    %cst = arith.constant 1.000000e+00 : f32
    %2 = vector.broadcast %cst : f32 to vector<1x256xf32>
    %c36 = arith.constant 36 : index
    %c0_3 = arith.constant 0 : index
    %3 = vector.load %arg6[%c36, %c0_3] : memref<37x256xf32, #tpu.memory_space<vmem>>, vector<1x256xf32>
    tpu.vector_store %arg6[%c36, %c0_3], %2 {strides = array<i32>} : memref<37x256xf32, #tpu.memory_space<vmem>>, vector<1x256xf32>,
    %c0_4 = arith.constant 0 : index
    %c0_5 = arith.constant 0 : index
    %4 = vector.load %arg3[%c0_4, %c0_5] : memref<4x37xf32, #tpu.memory_space<vmem>>, vector<4x37xf32>
    %c17_i32 = arith.constant 17 : i32
    %5 = tpu.dynamic_rotate %0 by %c17_i32 dim 1 : vector<4x256xf32>, i32 -> vector<4x256xf32>
    %6 = vector.extract_strided_slice %1 {offsets = [0, 0], sizes = [1, 256], strides = [1, 1]} : vector<8x256xf32> to vector<1x256xf32>
    %7 = vector.broadcast %6 : vector<1x256xf32> to vector<4x256xf32>
    %8 = arith.mulf %5, %7 : vector<4x256xf32>
    %c0_6 = arith.constant 0 : index
    %c0_7 = arith.constant 0 : index
    %9 = vector.load %arg6[%c0_6, %c0_7] : memref<37x256xf32, #tpu.memory_space<vmem>>, vector<4x256xf32>
    tpu.vector_store %arg6[%c0_6, %c0_7], %8 {strides = array<i32>} : memref<37x256xf32, #tpu.memory_space<vmem>>, vector<4x256xf32>,
    %c16_i32 = arith.constant 16 : i32
    %10 = tpu.dynamic_rotate %0 by %c16_i32 dim 1 : vector<4x256xf32>, i32 -> vector<4x256xf32>
    %11 = vector.extract_strided_slice %1 {offsets = [1, 0], sizes = [1, 256], strides = [1, 1]} : vector<8x256xf32> to vector<1x256xf32>
    %12 = vector.broadcast %11 : vector<1x256xf32> to vector<4x256xf32>
    %13 = arith.mulf %10, %12 : vector<4x256xf32>
    %c4 = arith.constant 4 : index
    %c0_8 = arith.constant 0 : index
    %14 = vector.load %arg6[%c4, %c0_8] : memref<37x256xf32, #tpu.memory_space<vmem>>, vector<4x256xf32>
    tpu.vector_store %arg6[%c4, %c0_8], %13 {strides = array<i32>} : memref<37x256xf32, #tpu.memory_space<vmem>>, vector<4x256xf32>,
    %c15_i32 = arith.constant 15 : i32
    %15 = tpu.dynamic_rotate %0 by %c15_i32 dim 1 : vector<4x256xf32>, i32 -> vector<4x256xf32>
    %16 = vector.extract_strided_slice %1 {offsets = [2, 0], sizes = [1, 256], strides = [1, 1]} : vector<8x256xf32> to vector<1x256xf32>
    %17 = vector.broadcast %16 : vector<1x256xf32> to vector<4x256xf32>
    %18 = arith.mulf %15, %17 : vector<4x256xf32>
    %c8 = arith.constant 8 : index
    %c0_9 = arith.constant 0 : index
    %19 = vector.load %arg6[%c8, %c0_9] : memref<37x256xf32, #tpu.memory_space<vmem>>, vector<4x256xf32>
    tpu.vector_store %arg6[%c8, %c0_9], %18 {strides = array<i32>} : memref<37x256xf32, #tpu.memory_space<vmem>>, vector<4x256xf32>,
    %c1_i32 = arith.constant 1 : i32
    %20 = tpu.dynamic_rotate %0 by %c1_i32 dim 1 : vector<4x256xf32>, i32 -> vector<4x256xf32>
    %21 = vector.extract_strided_slice %1 {offsets = [3, 0], sizes = [1, 256], strides = [1, 1]} : vector<8x256xf32> to vector<1x256xf32>
    %22 = vector.broadcast %21 : vector<1x256xf32> to vector<4x256xf32>
    %23 = arith.mulf %20, %22 : vector<4x256xf32>
    %c12 = arith.constant 12 : index
    %c0_10 = arith.constant 0 : index
    %24 = vector.load %arg6[%c12, %c0_10] : memref<37x256xf32, #tpu.memory_space<vmem>>, vector<4x256xf32>
    tpu.vector_store %arg6[%c12, %c0_10], %23 {strides = array<i32>} : memref<37x256xf32, #tpu.memory_space<vmem>>, vector<4x256xf32>,
    %c16 = arith.constant 16 : index
    %c0_11 = arith.constant 0 : index
    %25 = vector.load %arg6[%c16, %c0_11] : memref<37x256xf32, #tpu.memory_space<vmem>>, vector<4x256xf32>
    tpu.vector_store %arg6[%c16, %c0_11], %0 {strides = array<i32>} : memref<37x256xf32, #tpu.memory_space<vmem>>, vector<4x256xf32>,
    %c255_i32 = arith.constant 255 : i32
    %26 = tpu.dynamic_rotate %0 by %c255_i32 dim 1 : vector<4x256xf32>, i32 -> vector<4x256xf32>
    %27 = vector.extract_strided_slice %1 {offsets = [4, 0], sizes = [1, 256], strides = [1, 1]} : vector<8x256xf32> to vector<1x256xf32>
    %28 = vector.broadcast %27 : vector<1x256xf32> to vector<4x256xf32>
    %29 = arith.mulf %26, %28 : vector<4x256xf32>
    %c20 = arith.constant 20 : index
    %c0_12 = arith.constant 0 : index
    %30 = vector.load %arg6[%c20, %c0_12] : memref<37x256xf32, #tpu.memory_space<vmem>>, vector<4x256xf32>
    tpu.vector_store %arg6[%c20, %c0_12], %29 {strides = array<i32>} : memref<37x256xf32, #tpu.memory_space<vmem>>, vector<4x256xf32>,
    %c241_i32 = arith.constant 241 : i32
    %31 = tpu.dynamic_rotate %0 by %c241_i32 dim 1 : vector<4x256xf32>, i32 -> vector<4x256xf32>
    %32 = vector.extract_strided_slice %1 {offsets = [5, 0], sizes = [1, 256], strides = [1, 1]} : vector<8x256xf32> to vector<1x256xf32>
    %33 = vector.broadcast %32 : vector<1x256xf32> to vector<4x256xf32>
    %34 = arith.mulf %31, %33 : vector<4x256xf32>
    %c24 = arith.constant 24 : index
    %c0_13 = arith.constant 0 : index
    %35 = vector.load %arg6[%c24, %c0_13] : memref<37x256xf32, #tpu.memory_space<vmem>>, vector<4x256xf32>
    tpu.vector_store %arg6[%c24, %c0_13], %34 {strides = array<i32>} : memref<37x256xf32, #tpu.memory_space<vmem>>, vector<4x256xf32>,
    %c240_i32 = arith.constant 240 : i32
    %36 = tpu.dynamic_rotate %0 by %c240_i32 dim 1 : vector<4x256xf32>, i32 -> vector<4x256xf32>
    %37 = vector.extract_strided_slice %1 {offsets = [6, 0], sizes = [1, 256], strides = [1, 1]} : vector<8x256xf32> to vector<1x256xf32>
    %38 = vector.broadcast %37 : vector<1x256xf32> to vector<4x256xf32>
    %39 = arith.mulf %36, %38 : vector<4x256xf32>
    %c28 = arith.constant 28 : index
    %c0_14 = arith.constant 0 : index
    %40 = vector.load %arg6[%c28, %c0_14] : memref<37x256xf32, #tpu.memory_space<vmem>>, vector<4x256xf32>
    tpu.vector_store %arg6[%c28, %c0_14], %39 {strides = array<i32>} : memref<37x256xf32, #tpu.memory_space<vmem>>, vector<4x256xf32>,
    %c239_i32 = arith.constant 239 : i32
    %41 = tpu.dynamic_rotate %0 by %c239_i32 dim 1 : vector<4x256xf32>, i32 -> vector<4x256xf32>
    %42 = vector.extract_strided_slice %1 {offsets = [7, 0], sizes = [1, 256], strides = [1, 1]} : vector<8x256xf32> to vector<1x256xf32>
    %43 = vector.broadcast %42 : vector<1x256xf32> to vector<4x256xf32>
    %44 = arith.mulf %41, %43 : vector<4x256xf32>
    %c32 = arith.constant 32 : index
    %c0_15 = arith.constant 0 : index
    %45 = vector.load %arg6[%c32, %c0_15] : memref<37x256xf32, #tpu.memory_space<vmem>>, vector<4x256xf32>
    tpu.vector_store %arg6[%c32, %c0_15], %44 {strides = array<i32>} : memref<37x256xf32, #tpu.memory_space<vmem>>, vector<4x256xf32>,
    %c0_16 = arith.constant 0 : index
    %c0_17 = arith.constant 0 : index
    %46 = vector.load %arg6[%c0_16, %c0_17] : memref<37x256xf32, #tpu.memory_space<vmem>>, vector<37x256xf32>
    %cst_18 = arith.constant dense<0.000000e+00> : vector<4x256xf32>
    %47 = tpu.matmul %4, %46, %cst_18 {dimension_numbers = #tpu.dot_dimension_numbers<[1], [0], [0], [1], [0, 0, 1, 1], [], []>} : vector<4x37xf32>, vector<37x256xf32>, vector<4x256xf32> -> vector<4x256xf32>
    %cst_19 = arith.constant 0.000000e+00 : f32
    %48 = vector.broadcast %cst_19 : f32 to vector<4x256xf32>
    %49 = arith.maximumf %47, %48 : vector<4x256xf32>
    %c0_20 = arith.constant 0 : index
    %c0_21 = arith.constant 0 : index
    %50 = vector.load %arg4[%c0_20, %c0_21] : memref<4x37xf32, #tpu.memory_space<vmem>>, vector<4x37xf32>
    %c17_i32_22 = arith.constant 17 : i32
    %51 = tpu.dynamic_rotate %49 by %c17_i32_22 dim 1 : vector<4x256xf32>, i32 -> vector<4x256xf32>
    %52 = vector.extract_strided_slice %1 {offsets = [0, 0], sizes = [1, 256], strides = [1, 1]} : vector<8x256xf32> to vector<1x256xf32>
    %53 = vector.broadcast %52 : vector<1x256xf32> to vector<4x256xf32>
    %54 = arith.mulf %51, %53 : vector<4x256xf32>
    %c0_23 = arith.constant 0 : index
    %c0_24 = arith.constant 0 : index
    %55 = vector.load %arg6[%c0_23, %c0_24] : memref<37x256xf32, #tpu.memory_space<vmem>>, vector<4x256xf32>
    tpu.vector_store %arg6[%c0_23, %c0_24], %54 {strides = array<i32>} : memref<37x256xf32, #tpu.memory_space<vmem>>, vector<4x256xf32>,
    %c16_i32_25 = arith.constant 16 : i32
    %56 = tpu.dynamic_rotate %49 by %c16_i32_25 dim 1 : vector<4x256xf32>, i32 -> vector<4x256xf32>
    %57 = vector.extract_strided_slice %1 {offsets = [1, 0], sizes = [1, 256], strides = [1, 1]} : vector<8x256xf32> to vector<1x256xf32>
    %58 = vector.broadcast %57 : vector<1x256xf32> to vector<4x256xf32>
    %59 = arith.mulf %56, %58 : vector<4x256xf32>
    %c4_26 = arith.constant 4 : index
    %c0_27 = arith.constant 0 : index
    %60 = vector.load %arg6[%c4_26, %c0_27] : memref<37x256xf32, #tpu.memory_space<vmem>>, vector<4x256xf32>
    tpu.vector_store %arg6[%c4_26, %c0_27], %59 {strides = array<i32>} : memref<37x256xf32, #tpu.memory_space<vmem>>, vector<4x256xf32>,
    %c15_i32_28 = arith.constant 15 : i32
    %61 = tpu.dynamic_rotate %49 by %c15_i32_28 dim 1 : vector<4x256xf32>, i32 -> vector<4x256xf32>
    %62 = vector.extract_strided_slice %1 {offsets = [2, 0], sizes = [1, 256], strides = [1, 1]} : vector<8x256xf32> to vector<1x256xf32>
    %63 = vector.broadcast %62 : vector<1x256xf32> to vector<4x256xf32>
    %64 = arith.mulf %61, %63 : vector<4x256xf32>
    %c8_29 = arith.constant 8 : index
    %c0_30 = arith.constant 0 : index
    %65 = vector.load %arg6[%c8_29, %c0_30] : memref<37x256xf32, #tpu.memory_space<vmem>>, vector<4x256xf32>
    tpu.vector_store %arg6[%c8_29, %c0_30], %64 {strides = array<i32>} : memref<37x256xf32, #tpu.memory_space<vmem>>, vector<4x256xf32>,
    %c1_i32_31 = arith.constant 1 : i32
    %66 = tpu.dynamic_rotate %49 by %c1_i32_31 dim 1 : vector<4x256xf32>, i32 -> vector<4x256xf32>
    %67 = vector.extract_strided_slice %1 {offsets = [3, 0], sizes = [1, 256], strides = [1, 1]} : vector<8x256xf32> to vector<1x256xf32>
    %68 = vector.broadcast %67 : vector<1x256xf32> to vector<4x256xf32>
    %69 = arith.mulf %66, %68 : vector<4x256xf32>
    %c12_32 = arith.constant 12 : index
    %c0_33 = arith.constant 0 : index
    %70 = vector.load %arg6[%c12_32, %c0_33] : memref<37x256xf32, #tpu.memory_space<vmem>>, vector<4x256xf32>
    tpu.vector_store %arg6[%c12_32, %c0_33], %69 {strides = array<i32>} : memref<37x256xf32, #tpu.memory_space<vmem>>, vector<4x256xf32>,
    %c16_34 = arith.constant 16 : index
    %c0_35 = arith.constant 0 : index
    %71 = vector.load %arg6[%c16_34, %c0_35] : memref<37x256xf32, #tpu.memory_space<vmem>>, vector<4x256xf32>
    tpu.vector_store %arg6[%c16_34, %c0_35], %49 {strides = array<i32>} : memref<37x256xf32, #tpu.memory_space<vmem>>, vector<4x256xf32>,
    %c255_i32_36 = arith.constant 255 : i32
    %72 = tpu.dynamic_rotate %49 by %c255_i32_36 dim 1 : vector<4x256xf32>, i32 -> vector<4x256xf32>
    %73 = vector.extract_strided_slice %1 {offsets = [4, 0], sizes = [1, 256], strides = [1, 1]} : vector<8x256xf32> to vector<1x256xf32>
    %74 = vector.broadcast %73 : vector<1x256xf32> to vector<4x256xf32>
    %75 = arith.mulf %72, %74 : vector<4x256xf32>
    %c20_37 = arith.constant 20 : index
    %c0_38 = arith.constant 0 : index
    %76 = vector.load %arg6[%c20_37, %c0_38] : memref<37x256xf32, #tpu.memory_space<vmem>>, vector<4x256xf32>
    tpu.vector_store %arg6[%c20_37, %c0_38], %75 {strides = array<i32>} : memref<37x256xf32, #tpu.memory_space<vmem>>, vector<4x256xf32>,
    %c241_i32_39 = arith.constant 241 : i32
    %77 = tpu.dynamic_rotate %49 by %c241_i32_39 dim 1 : vector<4x256xf32>, i32 -> vector<4x256xf32>
    %78 = vector.extract_strided_slice %1 {offsets = [5, 0], sizes = [1, 256], strides = [1, 1]} : vector<8x256xf32> to vector<1x256xf32>
    %79 = vector.broadcast %78 : vector<1x256xf32> to vector<4x256xf32>
    %80 = arith.mulf %77, %79 : vector<4x256xf32>
    %c24_40 = arith.constant 24 : index
    %c0_41 = arith.constant 0 : index
    %81 = vector.load %arg6[%c24_40, %c0_41] : memref<37x256xf32, #tpu.memory_space<vmem>>, vector<4x256xf32>
    tpu.vector_store %arg6[%c24_40, %c0_41], %80 {strides = array<i32>} : memref<37x256xf32, #tpu.memory_space<vmem>>, vector<4x256xf32>,
    %c240_i32_42 = arith.constant 240 : i32
    %82 = tpu.dynamic_rotate %49 by %c240_i32_42 dim 1 : vector<4x256xf32>, i32 -> vector<4x256xf32>
    %83 = vector.extract_strided_slice %1 {offsets = [6, 0], sizes = [1, 256], strides = [1, 1]} : vector<8x256xf32> to vector<1x256xf32>
    %84 = vector.broadcast %83 : vector<1x256xf32> to vector<4x256xf32>
    %85 = arith.mulf %82, %84 : vector<4x256xf32>
    %c28_43 = arith.constant 28 : index
    %c0_44 = arith.constant 0 : index
    %86 = vector.load %arg6[%c28_43, %c0_44] : memref<37x256xf32, #tpu.memory_space<vmem>>, vector<4x256xf32>
    tpu.vector_store %arg6[%c28_43, %c0_44], %85 {strides = array<i32>} : memref<37x256xf32, #tpu.memory_space<vmem>>, vector<4x256xf32>,
    %c239_i32_45 = arith.constant 239 : i32
    %87 = tpu.dynamic_rotate %49 by %c239_i32_45 dim 1 : vector<4x256xf32>, i32 -> vector<4x256xf32>
    %88 = vector.extract_strided_slice %1 {offsets = [7, 0], sizes = [1, 256], strides = [1, 1]} : vector<8x256xf32> to vector<1x256xf32>
    %89 = vector.broadcast %88 : vector<1x256xf32> to vector<4x256xf32>
    %90 = arith.mulf %87, %89 : vector<4x256xf32>
    %c32_46 = arith.constant 32 : index
    %c0_47 = arith.constant 0 : index
    %91 = vector.load %arg6[%c32_46, %c0_47] : memref<37x256xf32, #tpu.memory_space<vmem>>, vector<4x256xf32>
    tpu.vector_store %arg6[%c32_46, %c0_47], %90 {strides = array<i32>} : memref<37x256xf32, #tpu.memory_space<vmem>>, vector<4x256xf32>,
    %c0_48 = arith.constant 0 : index
    %c0_49 = arith.constant 0 : index
    %92 = vector.load %arg6[%c0_48, %c0_49] : memref<37x256xf32, #tpu.memory_space<vmem>>, vector<37x256xf32>
    %cst_50 = arith.constant dense<0.000000e+00> : vector<4x256xf32>
    %93 = tpu.matmul %50, %92, %cst_50 {dimension_numbers = #tpu.dot_dimension_numbers<[1], [0], [0], [1], [0, 0, 1, 1], [], []>} : vector<4x37xf32>, vector<37x256xf32>, vector<4x256xf32> -> vector<4x256xf32>
    %94 = arith.addf %93, %0 : vector<4x256xf32>
    %cst_51 = arith.constant 0.000000e+00 : f32
    %95 = vector.broadcast %cst_51 : f32 to vector<4x256xf32>
    %96 = arith.maximumf %94, %95 : vector<4x256xf32>
    %c0_52 = arith.constant 0 : index
    %c0_53 = arith.constant 0 : index
    %97 = vector.load %arg5[%c0_52, %c0_53] : memref<4x256xf32, #tpu.memory_space<vmem>>, vector<4x256xf32>
    tpu.vector_store %arg5[%c0_52, %c0_53], %96 {strides = array<i32>} : memref<4x256xf32, #tpu.memory_space<vmem>>, vector<4x256xf32>,
    return
  }
  func.func @transform_0(%arg0: i32) -> (i32, i32) {
    %c0_i32 = arith.constant 0 : i32
    %c0_i32_0 = arith.constant 0 : i32
    %c0_i32_1 = arith.constant 0 : i32
    return %c0_i32, %c0_i32_0 : i32, i32
  }
  func.func @transform_1(%arg0: i32) -> (i32, i32) {
    %c0_i32 = arith.constant 0 : i32
    %c0_i32_0 = arith.constant 0 : i32
    return %c0_i32, %arg0 : i32, i32
  }
  func.func @transform_2(%arg0: i32) -> (i32, i32) {
    %c0_i32 = arith.constant 0 : i32
    %c0_i32_0 = arith.constant 0 : i32
    %c0_i32_1 = arith.constant 0 : i32
    return %c0_i32, %c0_i32_0 : i32, i32
  }
  func.func @transform_3(%arg0: i32) -> (i32, i32) {
    %c0_i32 = arith.constant 0 : i32
    %c0_i32_0 = arith.constant 0 : i32
    %c0_i32_1 = arith.constant 0 : i32
    return %c0_i32, %c0_i32_0 : i32, i32
  }
  func.func @transform_4(%arg0: i32) -> (i32, i32) {
    %c0_i32 = arith.constant 0 : i32
    %c0_i32_0 = arith.constant 0 : i32
    return %c0_i32, %arg0 : i32, i32
  }
}

</mosaic_0001>

<bundles_post_ra>
// kernel: tpu_custom_call.1
= control target key start
LH: loop header
LB: loop body
LE: loop exit
PB: predicated region body
PF: predicated region fallthrough
CT: control target
= control target key end

     0   :  { %9 = vsyncpa [#allocation4], 0  ;;  %s1537_s0 = inlined_call_operand.hbm [shape: f32[8,256], index: 0, kind: input, shape index: {}]   ;;  %s1538_s1 = inlined_call_operand.hbm [shape: f32[4,512], index: 1, kind: input, shape index: {}]   ;;  %s1539_s2 = inlined_call_operand.vmem [shape: f32[4,37], index: 2, kind: input, shape index: {}]   ;;  %s1540_s3 = inlined_call_operand.vmem [shape: f32[4,37], index: 3, kind: input, shape index: {}]   ;;  %s1541_s4 = inlined_call_operand.hbm [shape: f32[4,512], index: 4, kind: output, shape index: {}]  }
   0x1   :  { %10 = vsyncpa [#allocation7], 0 }
   0x2   :  { %12 = vsyncpa [#allocation7 + $0x1], 0 }
   0x3   :  { %13 = vsyncpa [#allocation5], 0 }
   0x4   :  { %15 = vsyncpa [#allocation5 + $0x1], 0  ;;  %s1094_s15 = smov 0   ;;  %s1096_s16 = smov 0  }
   0x5   :  { %s1098_s17 = smov 0   ;;  %s1100_s18 = smov 0  }
   0x6 LB: > { %s1115_s19 = sadd.s32 4294967295, %s1054_s18   ;;  %s818_s20 = sadd.s32 4294967294, %s1054_s18   ;;  %s1054_s18 = sphi %s1100_s18, %s1565_s18   ;;  %s1050_s17 = sphi %s1098_s17, %s1564_s17   ;;  %s1046_s16 = sphi %s1096_s16, %s1563_s16   ;;  %s1042_s15 = sphi %s1094_s15, %s1562_s15  }
   0x7   : > { %p62_p0 = scmp.ne.s32.totalorder %s1046_s16, %s1042_s15  ;;  %p1542_p1 = scmp.eq.s32.totalorder %s1115_s19, 0 }
   0x8   : > { %p134_p3 = scmp.eq.s32.totalorder %s818_s20, 1  ;;  %p819_p5 = scmp.ge.s32.totalorder %s1054_s18, 1 }
   0x9   : > { %p1124_p4 = por %p1542_p1, %p62_p0  ;;  %p141_p7 = scmp.lt.s32.totalorder %s1054_s18, 3 }
   0xa   : > { %p1129_p6 = por %p134_p3, %p62_p0  ;;  %s1056_s24 = smov [#allocation3]  }
   0xb   : > { %s1545_s21 = scalar_select %p1124_p4, 1, 0 }
   0xc   : > { %s1546_s22 = scalar_select %p1129_p6, 1, 0 }
   0xd   : > { %p1134_p8 = pnand %p819_p5, %p141_p7  ;;  %s154_s25 = sshll.u32 %s1056_s24, 4  ;;  %s155_s25 = int_to_ptr.vmem [resolvable:$true] %s154_s25 }
   0xe   : > { %s1142_s26 = sadd.s32 1, %s1054_s18   ;;  %s49_s30 = sadd.s32 1, %s1050_s17 }
   0xf   : > { %s1547_s23 = scalar_select %p1134_p8, 1, 0 }
  0x10   : > { %p866_p10 = pneg %p1134_p8  ;;  %s46_s28 = ssub.s32 %s1054_s18, %s1142_s26 }
  0x11   : > { %p1152_p12 = scmp.eq.s32.totalorder %s46_s28, 0  ;;  %s926_s7 = scalar_lea.hbm %s1537_s0, 256 }
  0x12   : > { %p1146_p11 = pnand %p866_p10, %p1542_p1  ;;  %p927_p0 = scmp.ne.s32.totalorder %s1537_s0, %s926_s7 }
  0x13   : > { %s1549_s29 = scalar_select %p1152_p12, 1, 0 }
  0x14   : > { %p928_p3 = pneg %p1146_p11  ;;  %p933_p10 = scmp.lt.u32.totalorder %s926_s7, %s1537_s0 }
  0x16   : > { %p929_p5 = pnand %p928_p3, %p927_p0 }
  0x18   : > { %p930_p7 = pneg %p929_p5 }
  0x1a   : > { %p935_p9 = pnand %p933_p10, %p930_p7 }
  0x1c   : > { %938 = shalt.err (!%p935_p9)
}
  0x1d   : > { %s939_s12 = scalar_lea.vmem %s155_s25, 256  ;;  %p947_p6 = scmp.lt.s32.totalorder %s155_s25, %s155_s25 }
  0x1e   : > { %p940_p1 = scmp.ne.s32.totalorder %s155_s25, %s939_s12  ;;  %p948_p4 = scmp.lt.s32.totalorder %s939_s12, %s939_s12 }
  0x20   : > { %p942_p2 = pnand %p940_p1, %p928_p3  ;;  %p949_p8 = por %p948_p4, %p947_p6 }
  0x22   : > { %p943_p13 = pneg %p942_p2 }
  0x24   : > { %p950_p12 = pnand %p949_p8, %p943_p13 }
  0x26   : > { %953 = shalt.err (!%p950_p12)
}
  0x27   : > { %869 = dma.hbm_to_vmem [thread:$0]  (!%p1146_p11), %s1537_s0, 256, %s155_s25, [#allocation4]  }
  0x28   : > { %p1550_p1 = scmp.ne.s32.totalorder %s1549_s29, 0  ;;  %p57_p2 = scmp.eq.s32.totalorder %s1054_s18, 0 }
  0x29   : > { %p1551_p4 = scmp.ne.s32.totalorder %s1050_s17, %s1046_s16  ;;  %p1552_p6 = scmp.eq.s32.totalorder %s1115_s19, 1 }
  0x2a   : > { %s1178_s20 = scalar_select %p1550_p1, %s1050_s17, %s49_s30  }
  0x2b   : > { %p1186_p8 = por %p1552_p6, %p1551_p4  ;;  %p879_p9 = scmp.lt.s32.totalorder %s1054_s18, 2 }
  0x2c   : > { %s171_s27 = sand.u32 1, %s1050_s17   ;;  %p1554_p12 = pmov %p1551_p4 }
  0x2d   : > { %s822_s28 = sshll.u32 %s171_s27, 3  ;;  %s840_s5 = sshll.u32 %s1054_s18, 7 }
  0x2e   : > { %p58_p13 = por %p57_p2, %p1554_p12  ;;  %s1199_s25 = scalar_lea.hbm %s1538_s1, %s840_s5 }
  0x2f   : > { %s175_s29 = scalar_lea.vmem [#allocation6], %s822_s28  ;;  %s172_s9 = scalar_lea.sflag [#allocation7], %s171_s27 }
  0x30   : > { %s183_s30 = sshll.u32 %s175_s29, 4  ;;  %p1201_p11 = pnand %p879_p9, %p58_p13  ;;  %s1205_s30 = int_to_ptr.vmem [resolvable:$true] %s183_s30 }
  0x31   : > { %s954_s10 = scalar_lea.hbm %s1199_s25, 128  ;;  %s959_s13 = scalar_lea.hbm %s1538_s1, 256 }
  0x32   : > { %p955_p0 = scmp.ne.s32.totalorder %s1199_s25, %s954_s10  ;;  %p956_p3 = pneg %p1201_p11 }
  0x33   : > { %p960_p10 = scmp.lt.u32.totalorder %s1199_s25, %s1538_s1  ;;  %p961_p1 = scmp.lt.u32.totalorder %s959_s13, %s954_s10 }
  0x34   : > { %p957_p5 = pnand %p956_p3, %p955_p0  ;;  %p963_p4 = scmp.lt.u32.totalorder %s954_s10, %s1199_s25 }
  0x35   : > { %p962_p2 = por %p961_p1, %p960_p10 }
  0x36   : > { %p958_p7 = pneg %p957_p5 }
  0x37   : > { %p964_p6 = por %p963_p4, %p962_p2 }
  0x39   : > { %p965_p9 = pnand %p964_p6, %p958_p7 }
  0x3b   : > { %968 = shalt.err (!%p965_p9)
}
  0x3c   : > { %s969_s27 = scalar_lea.vmem %s1205_s30, 128  ;;  %s1057_s5 = smov [#allocation6]  }
  0x3d   : > { %p970_p12 = scmp.ne.s32.totalorder %s1205_s30, %s969_s27  ;;  %s974_s6 = sshll.u32 %s1057_s5, 4  ;;  %s975_s6 = int_to_ptr.vmem [resolvable:$false] %s974_s6 }
  0x3e   : > { %s976_s7 = scalar_lea.vmem %s975_s6, 256  ;;  %p977_p5 = scmp.lt.s32.totalorder %s1205_s30, %s975_s6 }
  0x3f   : > { %p972_p13 = pnand %p970_p12, %p956_p3  ;;  %p978_p10 = scmp.lt.s32.totalorder %s976_s7, %s969_s27 }
  0x41   : > { %p973_p0 = pneg %p972_p13  ;;  %p979_p1 = por %p978_p10, %p977_p5 }
  0x43   : > { %p980_p2 = pnand %p979_p1, %p973_p0 }
  0x45   : > { %983 = shalt.err (!%p980_p2)
}
  0x46   : > { %873 = dma.hbm_to_vmem [thread:$0]  (!%p1201_p11), %s1199_s25, 128, %s1205_s30, %s172_s9  }
  0x47   : > { %p1556_p7 = scmp.ne.s32.totalorder %s1547_s23, 0 }
  0x48   : > { %p1557_p3 = scmp.eq.s32.totalorder (!%p1556_p7), %s1115_s19, 0 }
  0x49   : > { %192 = sbr.rel (%p1556_p7) target bundleno = 850 (0x352), region = 36 }
  0x50   : > { %1029 = dma.done.wait (%p1557_p3), [#allocation4], 256   ;;  %p1558_p4 = pmov %p1557_p3 }
  0x51   : > { %s1239_s29 = sand.u32 1, %s1046_s16   ;;  %p1559_p11 = scmp.ne.s32.totalorder %s1545_s21, 0 }
  0x52   : > { %1031 = vsyncadd (%p1558_p4), [#allocation4], 4294967040  ;;  %s827_s8 = sshll.u32 %s1239_s29, 3  ;;  %s199_s10 = scalar_lea.sflag [#allocation7], %s1239_s29 }
  0x53   : > { %s202_s25 = scalar_lea.vmem [#allocation6], %s827_s8 }
  0x54   : > { %1033 = dma.done.wait (%p1559_p11), %s199_s10, 128  }
  0x55   : > { %1035 = vsyncadd (%p1559_p11), %s199_s10, 4294967168  ;;  %v1249_v0 = vld [vmem:[%s202_s25] sm:$0xff]  ;;  %s1058_s23 = smov 1   ;;  %s1059_s30 = smov 16   ;;  %v232_v2 = vlaneseq  ;;  %v1064_v3 = vmov 1.0   ;;  %v1067_v4 = vmov 0.0  }
  0x56   : > { %308 = vrot.lane.b32.xlu1 %v1249_v0, %s1058_s23  ;;  %333 = vst [vmem:[#allocation2 + $0x20] sm:$0xf] %v1249_v0  ;;  %264 = vrot.lane.b32.xlu0 %v1249_v0, %s1059_s30  ;;  %v1258_v1 = vcombine.high %v1249_v0, %v1249_v0  ;;  %s1060_s21 = smov 17   ;;  %s1061_s9 = smov 15   ;;  %v1294_v8 = vld [vmem:[#allocation3] sm:$0xff]  ;;  %v1296_v9 = vld [vmem:[#allocation3 + $0x8] sm:$0xff] }
  0x57   : > { %s1062_s11 = smov 127   ;;  %vm234_vm0 = vcmp.lt.s32.totalorder %v232_v2, 256  ;;  %s1063_s12 = smov 112   ;;  %508 = vmatprep.mubr.f32.mxu0 %v1067_v4  ;;  %707 = vmatprep.mubr.f32.mxu1 %v1067_v4  ;;  %v1289_v5 = vshrl.u32 %v232_v2, 7  ;;  %v1291_v6 = vand.u32 127, %v232_v2  ;;  %vm437_vm9 = vcmask 1044480  }
  0x58   : > { %334 = vst [vmem:[#allocation2 + $0x28] sm:$0xf] %v1258_v1  ;;  %237 = vst.msk [vmem:[#allocation2 + $0x44] ss:$8 sm:$0x3] %vm234_vm0, %v1064_v3  ;;  %s1065_s13 = smov 113  }
  0x59   : > { %s1066_s14 = smov 111   ;;  %v317_v7 = vsub.s32 3, %v1289_v5  ;;  %v254_v12 = vsub.s32 0, %v1289_v5  ;;  %vm312_vm1 = vcmp.lt.s32.totalorder %v1291_v6, 1  ;;  %v273_v15 = vsub.s32 1, %v1289_v5  ;;  %s841_s7 = sshll.u32 %s1115_s19, 7 }
  0x5a   : > { %243 = vrot.lane.b32.xlu0 %v1249_v0, %s1060_s21  ;;  %310 = vrot.lane.b32.xlu1 %v1258_v1, %s1058_s23  ;;  %vm249_vm2 = vcmp.lt.s32.totalorder %v1291_v6, 17  ;;  %vm268_vm3 = vcmp.lt.s32.totalorder %v1291_v6, 16  ;;  %v298_v18 = vsub.s32 2, %v1289_v5  ;;  %vm293_vm4 = vcmp.lt.s32.totalorder %v1291_v6, 15  ;;  %s226_s10 = scalar_lea.vmem [#allocation8], %s827_s8  ;;  %s1068_s19 = smov [#allocation8]  }
  0x5b   : > { %v1301_v13 = vrot.slane %v1294_v8, %v317_v7  ;;  %v1304_v14 = vrot.slane %v1296_v9, %v317_v7  ;;  %v1315_v21 = vrot.slane %v1294_v8, %v254_v12  ;;  %v1318_v22 = vrot.slane %v1296_v9, %v254_v12  ;;  %s736_s25 = sshll.u32 %s226_s10, 4  ;;  %s988_s8 = sshll.u32 %s1068_s19, 4  ;;  %s1495_s25 = int_to_ptr.vmem [resolvable:$true] %s736_s25  ;;  %s989_s8 = int_to_ptr.vmem [resolvable:$false] %s988_s8 }
  0x5c   : > { %v1323_v25 = vrot.slane %v1294_v8, %v273_v15  ;;  %v1326_v26 = vrot.slane %v1296_v9, %v273_v15  ;;  %v344_v27 = vsub.s32 4, %v1289_v5  ;;  %v1331_v32 = vrot.slane %v1294_v8, %v298_v18  ;;  %p991_p13 = scmp.lt.s32.totalorder %s1495_s25, %s989_s8 }
  0x5d   : > { %v1334_v33 = vrot.slane %v1296_v9, %v298_v18  ;;  %vm339_vm5 = vcmp.lt.s32.totalorder %v1291_v6, 127  ;;  %v388_v52 = vsub.s32 6, %v1289_v5  ;;  %vm383_vm6 = vcmp.lt.s32.totalorder %v1291_v6, 112 }
  0x5e   : > { %245 = vrot.lane.b32.xlu1 %v1258_v1, %s1060_s21  ;;  %266 = vrot.lane.b32.xlu0 %v1258_v1, %s1059_s30  ;;  %v1354_v48 = vrot.slane %v1294_v8, %v344_v27  ;;  %v1359_v51 = vrot.slane %v1296_v9, %v344_v27  ;;  %v369_v57 = vsub.s32 5, %v1289_v5  ;;  %vm364_vm7 = vcmp.lt.s32.totalorder %v1291_v6, 113 }
  0x5f   : > { %v1371_v60 = vrot.slane %v1294_v8, %v388_v52  ;;  %v1374_v61 = vrot.slane %v1296_v9, %v388_v52  ;;  %vm408_vm8 = vcmp.lt.s32.totalorder %v1291_v6, 111  ;;  %v239_v52 = vld [vmem:[%s1539_s2] sm:$0xf]  ;;  %vm433_vm10 = vcmask 302080  }
  0x60   : > { %v1387_v15 = vrot.slane %v1296_v9, %v369_v57  ;;  %v517_v6 = vld [vmem:[%s1540_s3] sm:$0xf] }
  0x62   : > { %291 = vrot.lane.b32.xlu1 %v1258_v1, %s1061_s9  ;;  %289 = vrot.lane.b32.xlu0 %v1249_v0, %s1061_s9 }
  0x66   : > { %337 = vrot.lane.b32.xlu1 %v1258_v1, %s1062_s11  ;;  %335 = vrot.lane.b32.xlu0 %v1249_v0, %s1062_s11 }
  0x6a   : > { %381 = vrot.lane.b32.xlu1 %v1258_v1, %s1063_s12  ;;  %379 = vrot.lane.b32.xlu0 %v1249_v0, %s1063_s12 }
  0x6e   : > { %362 = vrot.lane.b32.xlu1 %v1258_v1, %s1065_s13  ;;  %360 = vrot.lane.b32.xlu0 %v1249_v0, %s1065_s13 }
  0x72   : > { %406 = vrot.lane.b32.xlu1 %v1258_v1, %s1066_s14  ;;  %404 = vrot.lane.b32.xlu0 %v1249_v0, %s1066_s14 }
  0xc8   : > { %v309_v10 = vpop.permute.xlu1 %308  ;;  %v265_v11 = vpop.permute.xlu0 %264 }
  0xcc   : > { %v244_v16 = vpop.permute.xlu0 %243  ;;  %v311_v17 = vpop.permute.xlu1 %310 }
  0xcd   : > { %v313_v19 = vsel %vm312_vm1, %v309_v10, %v311_v17  ;;  %v314_v20 = vsel %vm312_vm1, %v311_v17, %v309_v10  ;;  %v1382_v10 = vrot.slane %v1294_v8, %v369_v57  ;;  %v413_v17 = vsub.s32 7, %v1289_v5 }
  0xce   : > { %v323_v23 = vmul.f32 %v1301_v13, %v314_v20  ;;  %v324_v24 = vmul.f32 %v1304_v14, %v313_v19 }
  0xd0   : > { %v327_v28 = vrot.slane %v323_v23, 4  ;;  %v328_v29 = vrot.slane %v324_v24, 4  ;;  %v246_v30 = vpop.permute.xlu1 %245  ;;  %v267_v31 = vpop.permute.xlu0 %266 }
  0xd1   : > { %v250_v34 = vsel %vm249_vm2, %v244_v16, %v246_v30  ;;  %v251_v35 = vsel %vm249_vm2, %v246_v30, %v244_v16  ;;  %v269_v36 = vsel %vm268_vm3, %v265_v11, %v267_v31  ;;  %v270_v37 = vsel %vm268_vm3, %v267_v31, %v265_v11 }
  0xd2   : > { %331 = vst [vmem:[#allocation2 + $0x10] sm:$0xf0] %v327_v28  ;;  %332 = vst [vmem:[#allocation2 + $0x18] sm:$0xf0] %v328_v29  ;;  %v260_v38 = vmul.f32 %v1315_v21, %v251_v35  ;;  %v261_v39 = vmul.f32 %v1318_v22, %v250_v34  ;;  %v279_v40 = vmul.f32 %v1323_v25, %v270_v37 }
  0xd3   : > { %v280_v41 = vmul.f32 %v1326_v26, %v269_v36  ;;  %v1398_v36 = vrot.slane %v1294_v8, %v413_v17  ;;  %v1401_v37 = vrot.slane %v1296_v9, %v413_v17 }
  0xd4   : > { %262 = vst [vmem:[#allocation2] sm:$0xf] %v260_v38  ;;  %263 = vst [vmem:[#allocation2 + $0x8] sm:$0xf] %v261_v39  ;;  %v283_v42 = vrot.slane %v279_v40, 4  ;;  %v292_v44 = vpop.permute.xlu1 %291  ;;  %v290_v45 = vpop.permute.xlu0 %289 }
  0xd5   : > { %v284_v43 = vrot.slane %v280_v41, 4  ;;  %v294_v46 = vsel %vm293_vm4, %v290_v45, %v292_v44  ;;  %v295_v47 = vsel %vm293_vm4, %v292_v44, %v290_v45 }
  0xd6   : > { %287 = vst [vmem:[#allocation2] sm:$0xf0] %v283_v42  ;;  %v304_v49 = vmul.f32 %v1331_v32, %v295_v47  ;;  %v305_v50 = vmul.f32 %v1334_v33, %v294_v46 }
  0xd7   : > { %288 = vst [vmem:[#allocation2 + $0x8] sm:$0xf0] %v284_v43 }
  0xd8   : > { %306 = vst [vmem:[#allocation2 + $0x10] sm:$0xf] %v304_v49  ;;  %307 = vst [vmem:[#allocation2 + $0x18] sm:$0xf] %v305_v50  ;;  %v338_v53 = vpop.permute.xlu1 %337  ;;  %v336_v54 = vpop.permute.xlu0 %335 }
  0xd9   : > { %v340_v55 = vsel %vm339_vm5, %v336_v54, %v338_v53  ;;  %v341_v56 = vsel %vm339_vm5, %v338_v53, %v336_v54 }
  0xda   : > { %v350_v58 = vmul.f32 %v1354_v48, %v340_v55  ;;  %v351_v59 = vmul.f32 %v1359_v51, %v341_v56 }
  0xdc   : > { %v354_v62 = vrot.slane %v350_v58, 4  ;;  %v355_v63 = vrot.slane %v351_v59, 4  ;;  %v382_v2 = vpop.permute.xlu1 %381  ;;  %v380_v3 = vpop.permute.xlu0 %379 }
  0xdd   : > { %v384_v4 = vsel %vm383_vm6, %v380_v3, %v382_v2  ;;  %v385_v7 = vsel %vm383_vm6, %v382_v2, %v380_v3  ;;  %v423_v19 = vld [vmem:[#allocation2] sm:$0xff] }
  0xde   : > { %358 = vst [vmem:[#allocation2 + $0x20] sm:$0xf0] %v354_v62  ;;  %359 = vst [vmem:[#allocation2 + $0x28] sm:$0xf0] %v355_v63  ;;  %v394_v11 = vmul.f32 %v1371_v60, %v384_v4  ;;  %v395_v12 = vmul.f32 %v1374_v61, %v385_v7  ;;  %v424_v16 = vld [vmem:[#allocation2 + $0x8] sm:$0xff] }
  0xdf   : > { %v426_v18 = vld [vmem:[#allocation2 + $0x18] sm:$0xff]  ;;  %v425_v20 = vld [vmem:[#allocation2 + $0x10] sm:$0xff] }
  0xe0   : > { %v398_v23 = vrot.slane %v394_v11, 4  ;;  %v399_v24 = vrot.slane %v395_v12, 4  ;;  %v363_v27 = vpop.permute.xlu1 %362  ;;  %v361_v28 = vpop.permute.xlu0 %360  ;;  %v842_v29 = vpack.c.bf16 %v426_v18, %v424_v16  ;;  %v844_v30 = vpack.c.bf16 %v425_v20, %v423_v19 }
  0xe1   : > { %v365_v31 = vsel %vm364_vm7, %v361_v28, %v363_v27  ;;  %v366_v34 = vsel %vm364_vm7, %v363_v27, %v361_v28 }
  0xe2   : > { %402 = vst [vmem:[#allocation2 + $0x30] sm:$0xf0] %v398_v23  ;;  %403 = vst [vmem:[#allocation2 + $0x38] sm:$0xf0] %v399_v24  ;;  %v375_v5 = vmul.f32 %v1382_v10, %v365_v31  ;;  %v376_v35 = vmul.f32 %v1387_v15, %v366_v34  ;;  %843 = vmatprep.subr.bf16.mxu0 %v842_v29 }
  0xe3   : > { %845 = vmatpush1.bf16.msra.mxu0 %v844_v30 }
  0xe4   : > { %377 = vst [vmem:[#allocation2 + $0x30] sm:$0xf] %v375_v5  ;;  %378 = vst [vmem:[#allocation2 + $0x38] sm:$0xf] %v376_v35  ;;  %v407_v38 = vpop.permute.xlu1 %406  ;;  %v405_v39 = vpop.permute.xlu0 %404 }
  0xe5   : > { %v409_v40 = vsel %vm408_vm8, %v405_v39, %v407_v38  ;;  %v410_v41 = vsel %vm408_vm8, %v407_v38, %v405_v39  ;;  %v428_v8 = vld [vmem:[#allocation2 + $0x28] sm:$0xff]  ;;  %v427_v44 = vld [vmem:[#allocation2 + $0x20] sm:$0xff] }
  0xe6   : > { %v419_v42 = vmul.f32 %v1398_v36, %v409_v40  ;;  %v420_v43 = vmul.f32 %v1401_v37, %v410_v41 }
  0xe8   : > { %421 = vst [vmem:[#allocation2 + $0x40] sm:$0xf] %v419_v42  ;;  %422 = vst [vmem:[#allocation2 + $0x48] sm:$0xf] %v420_v43 }
  0xeb   : > { %v430_v9 = vld [vmem:[#allocation2 + $0x38] sm:$0xff]  ;;  %v429_v45 = vld [vmem:[#allocation2 + $0x30] sm:$0xff] }
  0xec   : > { %v846_v46 = vpack.c.bf16 %v430_v9, %v428_v8  ;;  %v848_v47 = vpack.c.bf16 %v429_v45, %v427_v44 }
  0xee   : > { %847 = vmatprep.subr.bf16.mxu0 %v846_v46 }
  0xef   : > { %849 = vmatpush1.bf16.msra.mxu0 %v848_v47  ;;  %v432_v49 = vld [vmem:[#allocation2 + $0x48] sm:$0x1f]  ;;  %v431_v50 = vld [vmem:[#allocation2 + $0x40] sm:$0x1f] }
  0xf0   : > { %829 = vmatprep.subr.msk.mxu0 %vm437_vm9, %v432_v49 }
  0xf3   : > { %830 = vmatpush1.msk.msra.mxu0 %vm437_vm9, %v431_v50 }
  0xf4   : > { %831 = vmatmul.mubr.msk.f32.vlgmr.msra.gmra.mrb[0].mxu0 %vm433_vm10, %v239_v52 }
 0x1c7   : > { %v510_v53 = vpop.f32.mrb[0].mxu0 }
 0x1c8   : > { %v515_v54 = vmax.f32 %v510_v53, 0.0  ;;  %v512_v55 = vpop.f32.mrb[1].mxu0 }
 0x1c9   : > { %v516_v56 = vmax.f32 %v512_v55, 0.0 }
 0x1ca   : > { %570 = vst [vmem:[#allocation2 + $0x20] sm:$0xf] %v515_v54  ;;  %528 = vrot.lane.b32.xlu0 %v515_v54, %s1059_s30 }
 0x1cb   : > { %571 = vst [vmem:[#allocation2 + $0x28] sm:$0xf] %v516_v56  ;;  %530 = vrot.lane.b32.xlu1 %v516_v56, %s1059_s30 }
 0x1ce   : > { %554 = vrot.lane.b32.xlu0 %v515_v54, %s1058_s23 }
 0x1cf   : > { %556 = vrot.lane.b32.xlu1 %v516_v56, %s1058_s23 }
 0x1d2   : > { %518 = vrot.lane.b32.xlu0 %v515_v54, %s1060_s21 }
 0x1d3   : > { %520 = vrot.lane.b32.xlu1 %v516_v56, %s1060_s21  ;;  %s1493_s21 = scalar_lea.hbm %s1541_s4, %s841_s7 }
 0x1d6   : > { %544 = vrot.lane.b32.xlu0 %v515_v54, %s1061_s9 }
 0x1d7   : > { %546 = vrot.lane.b32.xlu1 %v516_v56, %s1061_s9  ;;  %s722_s9 = scalar_lea.sflag [#allocation5], %s1239_s29 }
 0x1da   : > { %572 = vrot.lane.b32.xlu0 %v515_v54, %s1062_s11 }
 0x1db   : > { %574 = vrot.lane.b32.xlu1 %v516_v56, %s1062_s11  ;;  %s984_s11 = scalar_lea.vmem %s1495_s25, 128 }
 0x1dc   : > { %p985_p6 = scmp.ne.s32.totalorder %s1495_s25, %s984_s11 }
 0x1de   : > { %598 = vrot.lane.b32.xlu0 %v515_v54, %s1063_s12  ;;  %p986_p9 = pnand %p985_p6, %p1186_p8 }
 0x1df   : > { %600 = vrot.lane.b32.xlu1 %v516_v56, %s1063_s12  ;;  %s990_s12 = scalar_lea.vmem %s989_s8, 256 }
 0x1e0   : > { %p987_p12 = pneg %p986_p9  ;;  %p992_p0 = scmp.lt.s32.totalorder %s990_s12, %s984_s11 }
 0x1e2   : > { %588 = vrot.lane.b32.xlu0 %v515_v54, %s1065_s13  ;;  %p993_p5 = por %p992_p0, %p991_p13 }
 0x1e3   : > { %590 = vrot.lane.b32.xlu1 %v516_v56, %s1065_s13 }
 0x1e4   : > { %p994_p10 = pnand %p993_p5, %p987_p12 }
 0x1e6   : > { %614 = vrot.lane.b32.xlu0 %v515_v54, %s1066_s14 }
 0x1e7   : > { %616 = vrot.lane.b32.xlu1 %v516_v56, %s1066_s14 }
 0x23c   : > { %v529_v57 = vpop.permute.xlu0 %528 }
 0x23d   : > { %v531_v58 = vpop.permute.xlu1 %530 }
 0x23e   : > { %v532_v59 = vsel %vm268_vm3, %v529_v57, %v531_v58  ;;  %v533_v62 = vsel %vm268_vm3, %v531_v58, %v529_v57 }
 0x23f   : > { %v534_v63 = vmul.f32 %v533_v62, %v1323_v25  ;;  %v535_v2 = vmul.f32 %v532_v59, %v1326_v26 }
 0x240   : > { %v555_v3 = vpop.permute.xlu0 %554 }
 0x241   : > { %v538_v4 = vrot.slane %v534_v63, 4  ;;  %v539_v7 = vrot.slane %v535_v2, 4  ;;  %v557_v11 = vpop.permute.xlu1 %556 }
 0x242   : > { %v558_v12 = vsel %vm312_vm1, %v555_v3, %v557_v11  ;;  %v559_v16 = vsel %vm312_vm1, %v557_v11, %v555_v3 }
 0x243   : > { %542 = vst [vmem:[#allocation2] sm:$0xf0] %v538_v4  ;;  %543 = vst [vmem:[#allocation2 + $0x8] sm:$0xf0] %v539_v7  ;;  %v560_v17 = vmul.f32 %v559_v16, %v1301_v13  ;;  %v561_v18 = vmul.f32 %v558_v12, %v1304_v14 }
 0x244   : > { %v519_v19 = vpop.permute.xlu0 %518 }
 0x245   : > { %v564_v25 = vrot.slane %v560_v17, 4  ;;  %v565_v20 = vrot.slane %v561_v18, 4  ;;  %v521_v26 = vpop.permute.xlu1 %520 }
 0x246   : > { %v522_v23 = vsel %vm249_vm2, %v519_v19, %v521_v26  ;;  %v523_v24 = vsel %vm249_vm2, %v521_v26, %v519_v19 }
 0x247   : > { %568 = vst [vmem:[#allocation2 + $0x10] sm:$0xf0] %v564_v25  ;;  %569 = vst [vmem:[#allocation2 + $0x18] sm:$0xf0] %v565_v20  ;;  %v524_v27 = vmul.f32 %v523_v24, %v1315_v21  ;;  %v525_v28 = vmul.f32 %v522_v23, %v1318_v22 }
 0x248   : > { %v545_v29 = vpop.permute.xlu0 %544 }
 0x249   : > { %526 = vst [vmem:[#allocation2] sm:$0xf] %v524_v27  ;;  %527 = vst [vmem:[#allocation2 + $0x8] sm:$0xf] %v525_v28  ;;  %v547_v13 = vpop.permute.xlu1 %546 }
 0x24a   : > { %v548_v14 = vsel %vm293_vm4, %v545_v29, %v547_v13  ;;  %v549_v30 = vsel %vm293_vm4, %v547_v13, %v545_v29 }
 0x24b   : > { %v550_v31 = vmul.f32 %v549_v30, %v1331_v32  ;;  %v551_v34 = vmul.f32 %v548_v14, %v1334_v33 }
 0x24c   : > { %v573_v5 = vpop.permute.xlu0 %572 }
 0x24d   : > { %552 = vst [vmem:[#allocation2 + $0x10] sm:$0xf] %v550_v31  ;;  %553 = vst [vmem:[#allocation2 + $0x18] sm:$0xf] %v551_v34  ;;  %v575_v21 = vpop.permute.xlu1 %574 }
 0x24e   : > { %v576_v22 = vsel %vm339_vm5, %v573_v5, %v575_v21  ;;  %v577_v35 = vsel %vm339_vm5, %v575_v21, %v573_v5 }
 0x24f   : > { %v578_v38 = vmul.f32 %v576_v22, %v1354_v48  ;;  %v579_v39 = vmul.f32 %v577_v35, %v1359_v51 }
 0x250   : > { %v599_v40 = vpop.permute.xlu0 %598  ;;  %v625_v44 = vld [vmem:[#allocation2 + $0x8] sm:$0xff]  ;;  %v624_v51 = vld [vmem:[#allocation2] sm:$0xff] }
 0x251   : > { %v582_v41 = vrot.slane %v578_v38, 4  ;;  %v583_v42 = vrot.slane %v579_v39, 4  ;;  %v601_v32 = vpop.permute.xlu1 %600 }
 0x252   : > { %v602_v33 = vsel %vm383_vm6, %v599_v40, %v601_v32  ;;  %v603_v43 = vsel %vm383_vm6, %v601_v32, %v599_v40 }
 0x253   : > { %586 = vst [vmem:[#allocation2 + $0x20] sm:$0xf0] %v582_v41  ;;  %587 = vst [vmem:[#allocation2 + $0x28] sm:$0xf0] %v583_v42  ;;  %v604_v8 = vmul.f32 %v602_v33, %v1371_v60  ;;  %v605_v9 = vmul.f32 %v603_v43, %v1374_v61 }
 0x254   : > { %v589_v48 = vpop.permute.xlu0 %588  ;;  %v627_v45 = vld [vmem:[#allocation2 + $0x18] sm:$0xff]  ;;  %v626_v46 = vld [vmem:[#allocation2 + $0x10] sm:$0xff] }
 0x255   : > { %v608_v47 = vrot.slane %v604_v8, 4  ;;  %v609_v49 = vrot.slane %v605_v9, 4  ;;  %v591_v50 = vpop.permute.xlu1 %590  ;;  %v850_v52 = vpack.c.bf16 %v627_v45, %v625_v44  ;;  %v852_v53 = vpack.c.bf16 %v626_v46, %v624_v51 }
 0x256   : > { %v592_v54 = vsel %vm364_vm7, %v589_v48, %v591_v50  ;;  %v593_v55 = vsel %vm364_vm7, %v591_v50, %v589_v48 }
 0x257   : > { %612 = vst [vmem:[#allocation2 + $0x30] sm:$0xf0] %v608_v47  ;;  %613 = vst [vmem:[#allocation2 + $0x38] sm:$0xf0] %v609_v49  ;;  %v594_v60 = vmul.f32 %v592_v54, %v1382_v10  ;;  %v595_v61 = vmul.f32 %v593_v55, %v1387_v15  ;;  %851 = vmatprep.subr.bf16.mxu1 %v850_v52 }
 0x258   : > { %v615_v56 = vpop.permute.xlu0 %614  ;;  %853 = vmatpush1.bf16.msra.mxu1 %v852_v53 }
 0x259   : > { %596 = vst [vmem:[#allocation2 + $0x30] sm:$0xf] %v594_v60  ;;  %597 = vst [vmem:[#allocation2 + $0x38] sm:$0xf] %v595_v61  ;;  %v617_v57 = vpop.permute.xlu1 %616 }
 0x25a   : > { %v618_v58 = vsel %vm408_vm8, %v615_v56, %v617_v57  ;;  %v619_v59 = vsel %vm408_vm8, %v617_v57, %v615_v56  ;;  %v629_v10 = vld [vmem:[#allocation2 + $0x28] sm:$0xff]  ;;  %v628_v2 = vld [vmem:[#allocation2 + $0x20] sm:$0xff] }
 0x25b   : > { %v620_v62 = vmul.f32 %v618_v58, %v1398_v36  ;;  %v621_v63 = vmul.f32 %v619_v59, %v1401_v37 }
 0x25d   : > { %622 = vst [vmem:[#allocation2 + $0x40] sm:$0xf] %v620_v62  ;;  %623 = vst [vmem:[#allocation2 + $0x48] sm:$0xf] %v621_v63 }
 0x260   : > { %v631_v15 = vld [vmem:[#allocation2 + $0x38] sm:$0xff]  ;;  %v630_v3 = vld [vmem:[#allocation2 + $0x30] sm:$0xff] }
 0x261   : > { %v854_v4 = vpack.c.bf16 %v631_v15, %v629_v10  ;;  %v856_v7 = vpack.c.bf16 %v630_v3, %v628_v2 }
 0x263   : > { %855 = vmatprep.subr.bf16.mxu1 %v854_v4 }
 0x264   : > { %857 = vmatpush1.bf16.msra.mxu1 %v856_v7  ;;  %v633_v11 = vld [vmem:[#allocation2 + $0x48] sm:$0x1f]  ;;  %v632_v36 = vld [vmem:[#allocation2 + $0x40] sm:$0x1f] }
 0x265   : > { %832 = vmatprep.subr.msk.mxu1 %vm437_vm9, %v633_v11 }
 0x268   : > { %833 = vmatpush1.msk.msra.mxu1 %vm437_vm9, %v632_v36 }
 0x269   : > { %834 = vmatmul.mubr.msk.f32.vlgmr.msra.gmra.mrb[0].mxu1 %vm433_vm10, %v517_v6 }
 0x33c   : > { %v709_v37 = vpop.f32.mrb[0].mxu1 }
 0x33d   : > { %v710_v12 = vadd.f32 %v709_v37, %v1249_v0  ;;  %v711_v16 = vpop.f32.mrb[1].mxu1 }
 0x33e   : > { %v712_v17 = vadd.f32 %v711_v16, %v1258_v1 }
 0x33f   : > { %v714_v18 = vmax.f32 %v710_v12, 0.0 }
 0x340   : > { %v715_v19 = vmax.f32 %v712_v17, 0.0 }
 0x342   : > { %v718_v25 = vcombine.low %v714_v18, %v715_v19 }
 0x344   : > { %720 = vst [vmem:[%s226_s10] sm:$0xff] %v718_v25 }
 0x345   : > { %997 = shalt.err (!%p994_p10)
}
 0x346   : > { %s998_s29 = scalar_lea.hbm %s1493_s21, 128  ;;  %s1002_s28 = scalar_lea.hbm %s1541_s4, 256 }
 0x347   : > { %p999_p1 = scmp.ne.s32.totalorder %s1493_s21, %s998_s29  ;;  %p1003_p3 = scmp.lt.u32.totalorder %s1493_s21, %s1541_s4 }
 0x348   : > { %p1004_p4 = scmp.lt.u32.totalorder %s1002_s28, %s998_s29  ;;  %p1006_p6 = scmp.lt.u32.totalorder %s998_s29, %s1493_s21 }
 0x349   : > { %p1000_p2 = pnand %p999_p1, %p1186_p8 }
 0x34a   : > { %p1005_p11 = por %p1004_p4, %p1003_p3 }
 0x34b   : > { %p1001_p7 = pneg %p1000_p2 }
 0x34c   : > { %p1007_p9 = por %p1006_p6, %p1005_p11 }
 0x34e   : > { %p1008_p12 = pnand %p1007_p9, %p1001_p7 }
 0x350   : > { %1011 = shalt.err (!%p1008_p12)
}
 0x351   : > { %864 = dma.vmem_to_hbm [thread:$0]  (%p1186_p8), %s1495_s25, 128, %s1493_s21, %s722_s9  }
 0x352 PF: > { %s748_s6 = sand.u32 1, %s1042_s15   ;;  %p1560_p13 = scmp.ne.s32.totalorder %s1546_s22, 0 }
 0x353   : > { %p1561_p0 = scmp.ge.s32.totalorder %s1054_s18, 2  ;;  %s749_s7 = scalar_lea.sflag [#allocation5], %s748_s6 }
 0x355   : > { %p875_p5 = pnand %p1561_p0, %p1560_p13 }
 0x357   : > { %1037 = dma.done.wait (!%p875_p5), %s749_s7, 128  }
 0x358   : > { %1039 = vsyncadd (!%p875_p5), %s749_s7, 4294967168  ;;  %p18_p10 = scmp.ge.s32.totalorder %s1142_s26, 4   ;;  %s1562_s15 = smov %s1046_s16 }
 0x359   : > { %s1563_s16 = smov %s1050_s17  ;;  %s1564_s17 = smov %s1178_s20 }
 0x35a   : > { %s1565_s18 = smov %s1142_s26  ;;  %20 = sbr.rel (!%p18_p10) target bundleno = 6 (0x6), region = 87 }
 0x361   :  { %754 = vsyncpa [#allocation4], 1 }
 0x362   :  { %756 = vsyncpa [#allocation4 + $0x1], 1 }
 0x363   :  { %757 = vsyncpa [#allocation7], 1 }
 0x364   :  { %759 = vsyncpa [#allocation7 + $0x1], 1 }
 0x365   :  { %760 = vsyncpa [#allocation5], 1 }
 0x366   :  { %762 = vsyncpa [#allocation5 + $0x1], 1 }

</bundles_post_ra>
